<compile_context>
chip_gen: v5e
topology: v5e:2x2
jax: 0.10.0
libtpu: 0.0.40
codegen_flags: <defaults>
</compile_context>

<pallas_src>
import jax
import jax.numpy as jnp
from jax.experimental import pallas as pl
from jax.experimental.pallas import tpu as pltpu


def _round_up(x, m):
    return ((x + m - 1) // m) * m


def _logistic_kernel(x_ref, w_ref, b_ref, o_ref):
    # MXU matmul with f32 accumulation; bias add (VPU) + sigmoid (EUP) epilogue.
    y = jnp.dot(x_ref[...], w_ref[...], preferred_element_type=jnp.float32)
    y = jax.nn.sigmoid(y + b_ref[...])
    # The output block may be narrower than the lane-padded logits block when
    # D_out < 128: store only the real columns (static slice at trace time).
    o_ref[...] = y[:, : o_ref.shape[-1]].astype(o_ref.dtype)


def _vmem_sizes():
    """Return (budget for our buffers, vmem_limit_bytes), sized per generation."""
    try:
        cap = int(pltpu.get_tpu_info().vmem_capacity_bytes)
    except Exception:
        cap = 64 * 1024 * 1024  # conservative: v7x has 64 MiB per TensorCore
    # Leave headroom for compiler-internal scratch; never request > ~112 MiB.
    limit = min(cap - 8 * 1024 * 1024, 112 * 1024 * 1024)
    budget = int(limit * 0.85)
    return budget, limit


def logistic_regression_simple(x, weight, bias, *, out_dtype=None):
    """sigmoid(x @ weight.T + bias), matching torch.nn.Linear + torch.sigmoid.

    x: (B, D_in); weight: (D_out, D_in) (PyTorch layout); bias: (D_out,).
    out_dtype: optionally store the output in a narrower dtype (e.g. bf16) to
      halve the output HBM stream; defaults to x.dtype to preserve semantics.
    """
    B, D_in = x.shape
    D_out = weight.shape[0]
    x_dtype = x.dtype
    out_dtype = x_dtype if out_dtype is None else out_dtype
    x_isz = jnp.dtype(x_dtype).itemsize
    o_isz = jnp.dtype(out_dtype).itemsize
    w_isz = jnp.dtype(weight.dtype).itemsize

    budget, vmem_limit = _vmem_sizes()

    # Lane-dense weight: pad D_out up to a multiple of 128 (one-time, tiny).
    d_out_p = _round_up(D_out, 128)

    # ---- N (output-column) tiling: keep the whole weight resident whenever its
    # double-buffered footprint fits half the budget; otherwise tile columns.
    def _wb_bytes(tn):  # weight + f32 bias block, x2 for Pallas' default buffers
        return 2 * (D_in * tn * w_isz + tn * 4)

    if _wb_bytes(d_out_p) <= budget // 2:
        tn = d_out_p
    else:
        tn = max(128, ((budget // 2) // (2 * (D_in * w_isz + 4))) // 128 * 128)
        tn = min(tn, d_out_p)
    # TODO(synk): if even a (D_in, 128) weight block cannot fit VMEM (huge D_in),
    # a K-tiled grid over D_in with an f32 accumulator + pl.when init/finalize
    # is required; not implemented here.

    n_blocks = d_out_p // tn
    if n_blocks == 1:
        # Single N block: emit the output unpadded -> no write amplification
        # and no post-kernel column-slice copy.
        out_cols_total, out_block_cols = D_out, D_out
    else:
        out_cols_total, out_block_cols = d_out_p, tn

    # ---- Batch tile size: fill the remaining budget, cap per-tile bytes
    # (~8 MiB for x+out) instead of a fixed row count so small feature dims
    # aren't step-overhead dominated; never exceed the (rounded) batch.
    row_bytes = x_isz * D_in + o_isz * out_block_cols
    avail = budget - _wb_bytes(tn)
    tb = max(avail // (2 * row_bytes), 8)                # double-buffered x+out
    tb = min(tb, (8 * 1024 * 1024) // row_bytes, 4096)   # adaptive per-tile cap
    tb = min(tb, _round_up(B, 8))
    tb = max(8, (tb // 8) * 8)

    # One-time wrapper-side transpose / zero-pad of the parameters.
    if d_out_p == D_out:
        wt = weight.T
        b2 = bias.astype(jnp.float32).reshape(1, D_out)
    else:
        wt = jnp.zeros((D_in, d_out_p), weight.dtype).at[:, :D_out].set(weight.T)
        b2 = jnp.zeros((1, d_out_p), jnp.float32).at[0, :D_out].set(
            bias.astype(jnp.float32))

    # No batch padding of x: pl.cdiv handles the partial last block; its OOB
    # rows are never written back and no valid row depends on them.
    grid = (pl.cdiv(B, tb), n_blocks)

    out = pl.pallas_call(
        _logistic_kernel,
        out_shape=jax.ShapeDtypeStruct((B, out_cols_total), out_dtype),
        grid=grid,
        in_specs=[
            pl.BlockSpec((tb, D_in), lambda i, j: (i, 0)),   # streamed x tiles
            pl.BlockSpec((D_in, tn), lambda i, j: (0, j)),   # resident weight
            pl.BlockSpec((1, tn), lambda i, j: (0, j)),      # resident bias
        ],
        out_specs=pl.BlockSpec((tb, out_block_cols), lambda i, j: (i, j)),
        compiler_params=pltpu.CompilerParams(
            dimension_semantics=("parallel", "parallel"),
            vmem_limit_bytes=int(vmem_limit),
        ),
    )(x, wt, b2)

    # Column padding only exists on the N-tiled path; strip it there.
    return out if out_cols_total == D_out else out[:, :D_out]


if __name__ == "__main__":
    # Small, deterministic setup consistent with LogisticRegressionSimple(input_dim, output_dim).
    batch, input_dim, output_dim = 8, 32, 16
    key = jax.random.PRNGKey(0)
    kx, kw, kb = jax.random.split(key, 3)

    x = jax.random.normal(kx, (batch, input_dim), dtype=jnp.float32)
    # Deterministic parameter init (mimics nn.Linear's uniform(-1/sqrt(fan_in), 1/sqrt(fan_in))).
    bound = 1.0 / jnp.sqrt(jnp.float32(input_dim))
    weight = jax.random.uniform(kw, (output_dim, input_dim), jnp.float32, -bound, bound)
    bias = jax.random.uniform(kb, (output_dim,), jnp.float32, -bound, bound)

    out = logistic_regression_simple(x, weight, bias)
    jax.block_until_ready(out)

    # Reference check in plain JAX.
    ref = jax.nn.sigmoid(x @ weight.T + bias)
    assert out.shape == (batch, output_dim)
    assert jnp.allclose(out, ref, atol=1e-5, rtol=1e-5)
    print("KERNEL_OK")
</pallas_src>

<mosaic_0001>
module attributes {stable_mosaic.version = 11 : i64} {
  func.func @_logistic_kernel(%arg0: i32, %arg1: i32, %arg2: memref<8x32xf32, #tpu.memory_space<vmem>>, %arg3: memref<32x128xf32, #tpu.memory_space<vmem>>, %arg4: memref<1x128xf32, #tpu.memory_space<vmem>>, %arg5: memref<8x16xf32, #tpu.memory_space<vmem>>) attributes {dimension_semantics = [#tpu.dimension_semantics<parallel>, #tpu.dimension_semantics<parallel>], iteration_bounds = array<i64: 1, 1>, scalar_prefetch = 0 : i64, scratch_operands = 0 : i64, tpu.core_type = #tpu.core_type<tc>, window_params = [{transform_indices = @transform_0, window_bounds = array<i64: 8, 32>}, {transform_indices = @transform_1, window_bounds = array<i64: 32, 128>}, {transform_indices = @transform_2, window_bounds = array<i64: 1, 128>}, {transform_indices = @transform_3, window_bounds = array<i64: 8, 16>}]} {
    %c0 = arith.constant 0 : index
    %c0_0 = arith.constant 0 : index
    %0 = vector.load %arg2[%c0, %c0_0] : memref<8x32xf32, #tpu.memory_space<vmem>>, vector<8x32xf32>
    %c0_1 = arith.constant 0 : index
    %c0_2 = arith.constant 0 : index
    %1 = vector.load %arg3[%c0_1, %c0_2] : memref<32x128xf32, #tpu.memory_space<vmem>>, vector<32x128xf32>
    %cst = arith.constant dense<0.000000e+00> : vector<8x128xf32>
    %2 = tpu.matmul %0, %1, %cst {dimension_numbers = #tpu.dot_dimension_numbers<[1], [0], [0], [1], [0, 0, 1, 1], [], []>} : vector<8x32xf32>, vector<32x128xf32>, vector<8x128xf32> -> vector<8x128xf32>
    %c0_3 = arith.constant 0 : index
    %c0_4 = arith.constant 0 : index
    %3 = vector.load %arg4[%c0_3, %c0_4] : memref<1x128xf32, #tpu.memory_space<vmem>>, vector<1x128xf32>
    %4 = vector.broadcast %3 : vector<1x128xf32> to vector<8x128xf32>
    %5 = arith.addf %2, %4 : vector<8x128xf32>
    %6 = arith.negf %5 : vector<8x128xf32>
    %7 = math.exp %6 : vector<8x128xf32>
    %cst_5 = arith.constant 1.000000e+00 : f32
    %8 = vector.broadcast %cst_5 : f32 to vector<8x128xf32>
    %9 = arith.addf %8, %7 : vector<8x128xf32>
    %10 = arith.divf %8, %9 : vector<8x128xf32>
    %11 = vector.extract_strided_slice %10 {offsets = [0, 0], sizes = [8, 16], strides = [1, 1]} : vector<8x128xf32> to vector<8x16xf32>
    %c0_6 = arith.constant 0 : index
    %c0_7 = arith.constant 0 : index
    %12 = vector.load %arg5[%c0_6, %c0_7] : memref<8x16xf32, #tpu.memory_space<vmem>>, vector<8x16xf32>
    tpu.vector_store %arg5[%c0_6, %c0_7], %11 {strides = array<i32>} : memref<8x16xf32, #tpu.memory_space<vmem>>, vector<8x16xf32>,
    return
  }
  func.func @transform_0(%arg0: i32, %arg1: i32) -> (i32, i32) {
    %c0_i32 = arith.constant 0 : i32
    %c0_i32_0 = arith.constant 0 : i32
    return %arg0, %c0_i32 : i32, i32
  }
  func.func @transform_1(%arg0: i32, %arg1: i32) -> (i32, i32) {
    %c0_i32 = arith.constant 0 : i32
    %c0_i32_0 = arith.constant 0 : i32
    return %c0_i32, %arg1 : i32, i32
  }
  func.func @transform_2(%arg0: i32, %arg1: i32) -> (i32, i32) {
    %c0_i32 = arith.constant 0 : i32
    %c0_i32_0 = arith.constant 0 : i32
    return %c0_i32, %arg1 : i32, i32
  }
  func.func @transform_3(%arg0: i32, %arg1: i32) -> (i32, i32) {
    %c0_i32 = arith.constant 0 : i32
    return %arg0, %arg1 : i32, i32
  }
}

</mosaic_0001>

<bundles_post_ra>
// kernel: tpu_custom_call.1
= control target key start
LH: loop header
LB: loop body
LE: loop exit
PB: predicated region body
PF: predicated region fallthrough
CT: control target
= control target key end

     0   :  { %8 = vsyncpa [#allocation3], 0  ;;  %s244_s0 = inlined_call_operand.hbm [shape: f32[8,32], index: 0, kind: input, shape index: {}]   ;;  %s245_s1 = inlined_call_operand.hbm [shape: f32[32,128], index: 1, kind: input, shape index: {}]   ;;  %s246_s2 = inlined_call_operand.vmem [shape: f32[1,128], index: 2, kind: input, shape index: {}]   ;;  %s247_s3 = inlined_call_operand.hbm [shape: f32[8,16], index: 3, kind: output, shape index: {}]  }
   0x1   :  { %9 = vsyncpa [#allocation6], 0 }
   0x2   :  { %10 = vsyncpa [#allocation4], 0  ;;  %s16_s14 = sshll.u32 %s244_s0, 4  ;;  %s207_s15 = smov [#allocation2]   ;;  %s17_s14 = int_to_ptr.hbm [resolvable:$true] %s16_s14 }
   0x3   :  { %s18_s16 = sshll.u32 %s207_s15, 4  ;;  %s26_s19 = sshll.u32 %s245_s1, 4  ;;  %s19_s16 = int_to_ptr.vmem [resolvable:$true] %s18_s16  ;;  %s27_s19 = int_to_ptr.hbm [resolvable:$true] %s26_s19 }
   0x4   :  { %21 = dma.hbm_to_vmem [thread:$0]  %s17_s14, 128, %s19_s16, [#allocation3]  }
   0x5   :  { %s208_s20 = smov [#allocation5]   ;;  %s209_s22 = smov 128  }
   0x6   :  { %s28_s21 = sshll.u32 %s208_s20, 4  ;;  %s210_s23 = smov 8   ;;  %s29_s21 = int_to_ptr.vmem [resolvable:$true] %s28_s21 }
   0x7   :  { %34 = dma.hbm_to_vmem [thread:$0]  %s27_s19, 512, %s29_s21, [#allocation6], %s209_s22, %s209_s22, %s210_s23  }
   0x8   :  { %201 = dma.done.wait [#allocation3], 128  }
   0x9   :  { %202 = vsyncadd [#allocation3], 4294967168 }
   0xa   :  { %203 = dma.done.wait [#allocation6], 512  }
   0xb   :  { %204 = vsyncadd [#allocation6], 4294966784  ;;  %v49_v0 = vld [vmem:[#allocation5 + $0x18] sm:$0xff]  ;;  %v48_v1 = vld [vmem:[#allocation5 + $0x10] sm:$0xff]  ;;  %vm54_vm0 = vcmask 261120   ;;  %s211_s24 = smov [#allocation7]  }
   0xc   :  { %70 = vmatpush.msra.mxu0 %v49_v0  ;;  %v47_v2 = vld [vmem:[#allocation5 + $0x8] sm:$0xff]  ;;  %v46_v3 = vld [vmem:[#allocation5] sm:$0xff]  ;;  %v45_v4 = vld [vmem:[#allocation2] sm:$0xff]  ;;  %s104_s25 = sshll.u32 %s211_s24, 4  ;;  %vm97_vm4 = vcmask 130048   ;;  %s105_s25 = int_to_ptr.vmem [resolvable:$true] %s104_s25 }
   0xd   :  { %v124_v5 = vld [vmem:[%s246_s2] ss:$0 sm:$0xff]  ;;  %s106_s2 = sshll.u32 %s247_s3, 4  ;;  %s107_s2 = int_to_ptr.hbm [resolvable:$true] %s106_s2 }
   0xe   :  { %71 = vmatpush.msra.mxu0 %v48_v1 }
  0x10   :  { %72 = vmatpush.msra.mxu0 %v47_v2 }
  0x12   :  { %73 = vmatpush.msra.mxu0 %v46_v3 }
  0x13   :  { %117 = vmatmul.msk.f32.vlgmr.msra.gmra.mxu0 %vm54_vm0, %v45_v4 }
  0x90   :  { %v75_v6 = vpop.f32.mrf.mxu0 }
  0x91   :  { %v76_v7 = vadd.f32 %v124_v5, %v75_v6 }
  0x93   :  { %v118_v8 = vmul.f32 -1.442695, %v76_v7 }
  0x95   :  { %125 = vpow2.f32 %v118_v8 }
  0x9b   :  { %v126_v9 = vpop.eup %125 }
  0x9c   :  { %v81_v10 = vadd.f32 1.0, %v126_v9 }
  0x9e   :  { %127 = vrcp.f32 %v81_v10  ;;  %v93_v14 = vand.u32 2147483648, %v81_v10  ;;  %v91_v16 = vand.u32 2147483647, %v81_v10  ;;  %vm87_vm2 = vweird.f32 %v81_v10 }
  0xa0   :  { %v94_v18 = vor.u32 1.1754944e-38, %v93_v14  ;;  %vm92_vm5 = vcmp.eq.f32.partialorder %v91_v16, 8.507059e+37 }
  0xa4   :  { %v128_v11 = vpop.eup %127 }
  0xa5   :  { %v83_v12 = vmul.f32 %v128_v11, %v81_v10  ;;  %vm88_vm1 = vweird.f32 %v128_v11 }
  0xa6   :  { %vm89_vm3 = vmor %vm87_vm2, %vm88_vm1 }
  0xa7   :  { %v84_v13 = vsub.f32 1.0, %v83_v12 }
  0xa9   :  { %v85_v15 = vmul.f32 %v128_v11, %v84_v13 }
  0xab   :  { %v86_v17 = vadd.f32 %v128_v11, %v85_v15 }
  0xad   :  { %v90_v19 = vsel %vm89_vm3, %v128_v11, %v86_v17 }
  0xae   :  { %v95_v20 = vsel %vm92_vm5, %v94_v18, %v90_v19 }
  0xaf   :  { %98 = vst.msk [vmem:[#allocation7] sm:$0xff] %vm97_vm4, %v95_v20 }
  0xb0   :  { %109 = dma.vmem_to_hbm [thread:$0]  %s105_s25, 128, %s107_s2, [#allocation4]  }
  0xb1   :  { %205 = dma.done.wait [#allocation4], 128  }
  0xb2   :  { %206 = vsyncadd [#allocation4], 4294967168 }
  0xb3   :  { %114 = vsyncpa [#allocation3], 1 }
  0xb4   :  { %115 = vsyncpa [#allocation6], 1 }
  0xb5   :  { %116 = vsyncpa [#allocation4], 1 }

</bundles_post_ra>
